<compile_context>
chip_gen: v6e
topology: v6e:2x2x1
jax: 0.10.0
libtpu: 0.0.40
codegen_flags: <defaults>
</compile_context>

<pallas_src>
import functools

import jax
import jax.numpy as jnp
from jax import lax
from jax.experimental import pallas as pl
from jax.experimental.pallas import tpu as pltpu

HIDDEN = 128       # hidden width == one 128-lane tile (also padded action width)
IN_FEATURES = 4    # CartPole observation size
SUBLANE = 8        # f32 sublane tile


def _round_up(n, m):
    return -(-n // m) * m


# ---------------------------------------------------------------------------
# Kernel bodies
# ---------------------------------------------------------------------------

def _mlp(x_ref, w_ref, b_ref):
    """Shared 3-layer MLP body. Returns a (block_b, 128) f32 tile of Q-values.
    Real Q-values live in columns [0, num_actions); padded columns are exactly 0
    (w3/b3 padding is zero)."""
    wt = w_ref.dtype  # bf16 by default (MXU-native); f32 also supported
    x = x_ref[...].astype(wt)                                   # (bb, 4)

    # Layer 1: (bb,4) @ (4,128) -- contract over the 4 real features only, so the
    # wrapper never materializes a 32x-inflated padded x in HBM.
    h = jnp.dot(x, w_ref[0, :IN_FEATURES, :],
                preferred_element_type=jnp.float32) + b_ref[0:1, :]
    h = jnp.maximum(h, 0.0)

    # Layer 2: (bb,128) @ (128,128)
    h = jnp.dot(h.astype(wt), w_ref[1],
                preferred_element_type=jnp.float32) + b_ref[1:2, :]
    h = jnp.maximum(h, 0.0)

    # Layer 3: (bb,128) @ (128,128)
    return jnp.dot(h.astype(wt), w_ref[2],
                   preferred_element_type=jnp.float32) + b_ref[2:3, :]


def _dqn_kernel(x_ref, w_ref, b_ref, q_ref):
    q_ref[...] = _mlp(x_ref, w_ref, b_ref)


def _dqn_greedy_kernel(num_actions, x_ref, w_ref, b_ref, a_ref, v_ref):
    # Fused epsilon-greedy / TD-target epilogue: argmax_a Q and max_a Q computed
    # in-kernel, so no lane-sparse (B, num_actions) slice or separate argmax launch.
    q = _mlp(x_ref, w_ref, b_ref)                               # (bb, 128) f32
    col = lax.broadcasted_iota(jnp.int32, q.shape, 1)
    qm = jnp.where(col < num_actions, q, -jnp.inf)              # mask padded columns
    v = jnp.max(qm, axis=-1, keepdims=True)                     # (bb, 1) max_a Q
    a = jnp.min(jnp.where(qm == v, col, HIDDEN),
                axis=-1, keepdims=True)                         # first argmax (torch tie-break)
    a_ref[...] = a
    v_ref[...] = v


# ---------------------------------------------------------------------------
# Parameter packing / block selection
# ---------------------------------------------------------------------------

def pack_params(w1, b1, w2, b2, w3, b3, dtype=jnp.bfloat16):
    """Pack the 7 parameter arrays into two contiguous, tile-aligned slabs (once,
    host-side). Weights go to `dtype` (bf16 halves the grid-invariant weight DMA and
    is MXU-native); biases stay f32 (bias add / ReLU run in f32)."""
    num_actions = w3.shape[1]
    assert w1.shape == (IN_FEATURES, HIDDEN)
    assert w2.shape == (HIDDEN, HIDDEN)
    assert num_actions <= HIDDEN, "num_actions must be <= 128"

    w1p = jnp.zeros((HIDDEN, HIDDEN), jnp.float32).at[:IN_FEATURES, :].set(w1)
    w3p = jnp.zeros((HIDDEN, HIDDEN), jnp.float32).at[:, :num_actions].set(w3)
    w_slab = jnp.stack([w1p, w2.astype(jnp.float32), w3p]).astype(dtype)   # (3,128,128)

    b3p = jnp.zeros((HIDDEN,), jnp.float32).at[:num_actions].set(b3.reshape(-1))
    b_slab = jnp.stack([b1.reshape(-1).astype(jnp.float32),
                        b2.reshape(-1).astype(jnp.float32), b3p])          # (3,128)
    return w_slab, b_slab


def _block_and_grid(B, block_b):
    """Batch tiling: single block for tiny batches (action selection), otherwise
    >= 2 blocks so dimension_semantics=("parallel",) lands work on both TensorCores
    on v7x, capped at block_b rows. VMEM at block_b=1024 is ~1.3 MiB (double-buffered
    x/out + bf16 weights) -> no vmem_limit_bytes needed on any generation."""
    bp_min = _round_up(B, SUBLANE)
    if bp_min <= 128:
        bb = bp_min
    else:
        half = _round_up(bp_min // 2, SUBLANE)
        bb = min(block_b, half)
    bp = _round_up(B, bb)
    return bb, bp


def _pad_batch(x, bp):
    B = x.shape[0]
    xp = x.astype(jnp.float32)
    if bp != B:
        xp = jnp.zeros((bp, IN_FEATURES), jnp.float32).at[:B, :].set(xp)
    return xp


# ---------------------------------------------------------------------------
# Public wrappers
# ---------------------------------------------------------------------------

@functools.partial(jax.jit, static_argnames=("block_b",))
def dqn_forward_padded(x, w_slab, b_slab, *, block_b=1024):
    """Hot-path forward: lane-dense (Bp, 128) f32 Q block straight from the kernel.
    Real Q-values are in [:B, :num_actions]; padded rows (>= B) contain bias-only
    garbage and padded columns are zero -- callers must ignore them."""
    B, F = x.shape
    assert F == IN_FEATURES
    bb, bp = _block_and_grid(B, block_b)
    grid = (bp // bb,)
    xp = _pad_batch(x, bp)

    flops = 2 * bp * HIDDEN * (IN_FEATURES + HIDDEN + HIDDEN)
    bytes_accessed = (xp.size * 4 + w_slab.size * w_slab.dtype.itemsize
                      + b_slab.size * 4 + bp * HIDDEN * 4)

    return pl.pallas_call(
        _dqn_kernel,
        out_shape=jax.ShapeDtypeStruct((bp, HIDDEN), jnp.float32),
        grid_spec=pltpu.PrefetchScalarGridSpec(
            num_scalar_prefetch=0,
            grid=grid,
            in_specs=[
                pl.BlockSpec((bb, IN_FEATURES), lambda i: (i, 0)),        # x tile (unpadded feats)
                pl.BlockSpec((3, HIDDEN, HIDDEN), lambda i: (0, 0, 0)),   # weight slab (invariant)
                pl.BlockSpec((3, HIDDEN), lambda i: (0, 0)),              # bias slab (invariant)
            ],
            out_specs=pl.BlockSpec((bb, HIDDEN), lambda i: (i, 0)),
        ),
        compiler_params=pltpu.CompilerParams(
            dimension_semantics=("parallel",),
        ),
        cost_estimate=pl.CostEstimate(
            flops=flops, transcendentals=0, bytes_accessed=bytes_accessed
        ),
    )(xp, w_slab, b_slab)


@functools.partial(jax.jit, static_argnames=("num_actions", "block_b"))
def dqn_forward(x, w_slab, b_slab, *, num_actions, block_b=1024):
    """Module-equivalent forward: (B, num_actions) Q-values (matches DQN.forward).
    Prefer dqn_forward_padded / dqn_greedy on hot paths -- the trailing slice here
    materializes a lane-sparse copy in a separate XLA kernel."""
    q = dqn_forward_padded(x, w_slab, b_slab, block_b=block_b)
    return q[: x.shape[0], :num_actions]


@functools.partial(jax.jit, static_argnames=("num_actions", "block_b"))
def dqn_greedy(x, w_slab, b_slab, *, num_actions, block_b=1024):
    """Fused action-selection / TD-target path: returns (argmax_a Q, max_a Q), each (B,)."""
    B = x.shape[0]
    bb, bp = _block_and_grid(B, block_b)
    grid = (bp // bb,)
    xp = _pad_batch(x, bp)

    a, v = pl.pallas_call(
        functools.partial(_dqn_greedy_kernel, num_actions),
        out_shape=(jax.ShapeDtypeStruct((bp, 1), jnp.int32),
                   jax.ShapeDtypeStruct((bp, 1), jnp.float32)),
        grid_spec=pltpu.PrefetchScalarGridSpec(
            num_scalar_prefetch=0,
            grid=grid,
            in_specs=[
                pl.BlockSpec((bb, IN_FEATURES), lambda i: (i, 0)),
                pl.BlockSpec((3, HIDDEN, HIDDEN), lambda i: (0, 0, 0)),
                pl.BlockSpec((3, HIDDEN), lambda i: (0, 0)),
            ],
            out_specs=(pl.BlockSpec((bb, 1), lambda i: (i, 0)),
                       pl.BlockSpec((bb, 1), lambda i: (i, 0))),
        ),
        compiler_params=pltpu.CompilerParams(
            dimension_semantics=("parallel",),
        ),
    )(xp, w_slab, b_slab)
    return a[:B, 0], v[:B, 0]


def init_dqn_params(key, num_actions):
    """Deterministic init mimicking PyTorch's default Linear init
    (uniform(-1/sqrt(fan_in), 1/sqrt(fan_in)))."""

    def linear(key, fan_in, fan_out):
        kw, kb = jax.random.split(key)
        bound = 1.0 / jnp.sqrt(jnp.float32(fan_in))
        w = jax.random.uniform(kw, (fan_in, fan_out), jnp.float32, -bound, bound)
        b = jax.random.uniform(kb, (1, fan_out), jnp.float32, -bound, bound)
        return w, b

    k1, k2, k3 = jax.random.split(key, 3)
    w1, b1 = linear(k1, IN_FEATURES, HIDDEN)
    w2, b2 = linear(k2, HIDDEN, HIDDEN)
    w3, b3 = linear(k3, HIDDEN, num_actions)
    return w1, b1, w2, b2, w3, b3


if __name__ == "__main__":
    key = jax.random.PRNGKey(0)
    k_params, k_x, k_xb = jax.random.split(key, 3)

    num_actions = 2  # CartPole-v1 action space
    batch = 8        # observations are 4-dim CartPole states

    w1, b1, w2, b2, w3, b3 = init_dqn_params(k_params, num_actions)
    x = jax.random.normal(k_x, (batch, IN_FEATURES), jnp.float32)

    # Pack parameters once (host-side), reuse across calls.
    w_slab, b_slab = pack_params(w1, b1, w2, b2, w3, b3)                      # bf16 weights
    w_slab32, b_slab32 = pack_params(w1, b1, w2, b2, w3, b3, dtype=jnp.float32)

    # Module-equivalent forward (small batch -> single-block grid).
    q = dqn_forward(x, w_slab, b_slab, num_actions=num_actions)
    jax.block_until_ready(q)
    assert q.shape == (batch, num_actions)

    # References.
    def ref_fwd(xv):
        with jax.default_matmul_precision("highest"):
            h = jnp.maximum(xv @ w1 + b1, 0.0)
            h = jnp.maximum(h @ w2 + b2, 0.0)
            return h @ w3 + b3

    def ref_fwd_bf16(xv):  # matched-precision reference (bf16 operands, f32 accumulation)
        bf = jnp.bfloat16
        h = jnp.dot(xv.astype(bf), w1.astype(bf), preferred_element_type=jnp.float32) + b1
        h = jnp.maximum(h, 0.0)
        h = jnp.dot(h.astype(bf), w2.astype(bf), preferred_element_type=jnp.float32) + b2
        h = jnp.maximum(h, 0.0)
        return jnp.dot(h.astype(bf), w3.astype(bf), preferred_element_type=jnp.float32) + b3

    ref = ref_fwd(x)
    assert jnp.allclose(q, ref, atol=5e-2, rtol=5e-2)            # bf16-weight kernel vs f32 math
    assert jnp.allclose(q, ref_fwd_bf16(x), atol=2e-3, rtol=2e-3)

    # f32-weight path preserves the module's exact f32 semantics.
    q32 = dqn_forward(x, w_slab32, b_slab32, num_actions=num_actions)
    assert jnp.allclose(q32, ref, atol=1e-4, rtol=1e-4)

    # Fused greedy-action / max-Q epilogue (action-selection hot path).
    a, v = dqn_greedy(x, w_slab, b_slab, num_actions=num_actions)
    assert jnp.array_equal(a, jnp.argmax(q, axis=-1).astype(a.dtype))
    assert jnp.allclose(v, jnp.max(q, axis=-1), atol=1e-4)

    # Larger replay-buffer-style batch exercising the multi-block ("parallel") grid.
    big_b = 300
    xb = jax.random.normal(k_xb, (big_b, IN_FEATURES), jnp.float32)
    qb_pad = dqn_forward_padded(xb, w_slab, b_slab)               # lane-dense hot-path output
    jax.block_until_ready(qb_pad)
    assert jnp.allclose(qb_pad[:big_b, :num_actions], ref_fwd(xb), atol=5e-2, rtol=5e-2)

    print("KERNEL_OK")
</pallas_src>

<mosaic_0001>
module attributes {stable_mosaic.version = 11 : i64} {
  func.func @_dqn_kernel(%arg0: i32, %arg1: memref<8x4xf32, #tpu.memory_space<vmem>>, %arg2: memref<3x128x128xbf16, #tpu.memory_space<vmem>>, %arg3: memref<3x128xf32, #tpu.memory_space<vmem>>, %arg4: memref<8x128xf32, #tpu.memory_space<vmem>>) attributes {dimension_semantics = [#tpu.dimension_semantics<parallel>], iteration_bounds = array<i64: 1>, scalar_prefetch = 0 : i64, scratch_operands = 0 : i64, tpu.core_type = #tpu.core_type<tc>, window_params = [{transform_indices = @transform_0, window_bounds = array<i64: 8, 4>}, {pipeline_mode = #tpu.pipeline_mode<synchronous>, transform_indices = @transform_1, window_bounds = array<i64: 3, 128, 128>}, {pipeline_mode = #tpu.pipeline_mode<synchronous>, transform_indices = @transform_2, window_bounds = array<i64: 3, 128>}, {transform_indices = @transform_3, window_bounds = array<i64: 8, 128>}]} {
    %c0 = arith.constant 0 : index
    %c0_0 = arith.constant 0 : index
    %0 = vector.load %arg1[%c0, %c0_0] : memref<8x4xf32, #tpu.memory_space<vmem>>, vector<8x4xf32>
    %1 = arith.truncf %0 : vector<8x4xf32> to vector<8x4xbf16>
    %c0_1 = arith.constant 0 : index
    %c0_2 = arith.constant 0 : index
    %c0_3 = arith.constant 0 : index
    %2 = vector.load %arg2[%c0_1, %c0_2, %c0_3] : memref<3x128x128xbf16, #tpu.memory_space<vmem>>, vector<1x4x128xbf16>
    %3 = vector.shape_cast %2 : vector<1x4x128xbf16> to vector<4x128xbf16>
    %cst = arith.constant dense<0.000000e+00> : vector<8x128xf32>
    %4 = tpu.matmul %1, %3, %cst {dimension_numbers = #tpu.dot_dimension_numbers<[1], [0], [0], [1], [0, 0, 1, 1], [], []>} : vector<8x4xbf16>, vector<4x128xbf16>, vector<8x128xf32> -> vector<8x128xf32>
    %c0_4 = arith.constant 0 : index
    %c0_5 = arith.constant 0 : index
    %5 = vector.load %arg3[%c0_4, %c0_5] : memref<3x128xf32, #tpu.memory_space<vmem>>, vector<1x128xf32>
    %6 = vector.broadcast %5 : vector<1x128xf32> to vector<8x128xf32>
    %7 = arith.addf %4, %6 : vector<8x128xf32>
    %cst_6 = arith.constant 0.000000e+00 : f32
    %8 = vector.broadcast %cst_6 : f32 to vector<8x128xf32>
    %9 = arith.maximumf %7, %8 : vector<8x128xf32>
    %10 = arith.truncf %9 : vector<8x128xf32> to vector<8x128xbf16>
    %c1 = arith.constant 1 : index
    %c0_7 = arith.constant 0 : index
    %c0_8 = arith.constant 0 : index
    %11 = vector.load %arg2[%c1, %c0_7, %c0_8] : memref<3x128x128xbf16, #tpu.memory_space<vmem>>, vector<1x128x128xbf16>
    %12 = vector.shape_cast %11 : vector<1x128x128xbf16> to vector<128x128xbf16>
    %cst_9 = arith.constant dense<0.000000e+00> : vector<8x128xf32>
    %13 = tpu.matmul %10, %12, %cst_9 {dimension_numbers = #tpu.dot_dimension_numbers<[1], [0], [0], [1], [0, 0, 1, 1], [], []>} : vector<8x128xbf16>, vector<128x128xbf16>, vector<8x128xf32> -> vector<8x128xf32>
    %c1_10 = arith.constant 1 : index
    %c0_11 = arith.constant 0 : index
    %14 = vector.load %arg3[%c1_10, %c0_11] : memref<3x128xf32, #tpu.memory_space<vmem>>, vector<1x128xf32>
    %15 = vector.broadcast %14 : vector<1x128xf32> to vector<8x128xf32>
    %16 = arith.addf %13, %15 : vector<8x128xf32>
    %cst_12 = arith.constant 0.000000e+00 : f32
    %17 = vector.broadcast %cst_12 : f32 to vector<8x128xf32>
    %18 = arith.maximumf %16, %17 : vector<8x128xf32>
    %19 = arith.truncf %18 : vector<8x128xf32> to vector<8x128xbf16>
    %c2 = arith.constant 2 : index
    %c0_13 = arith.constant 0 : index
    %c0_14 = arith.constant 0 : index
    %20 = vector.load %arg2[%c2, %c0_13, %c0_14] : memref<3x128x128xbf16, #tpu.memory_space<vmem>>, vector<1x128x128xbf16>
    %21 = vector.shape_cast %20 : vector<1x128x128xbf16> to vector<128x128xbf16>
    %cst_15 = arith.constant dense<0.000000e+00> : vector<8x128xf32>
    %22 = tpu.matmul %19, %21, %cst_15 {dimension_numbers = #tpu.dot_dimension_numbers<[1], [0], [0], [1], [0, 0, 1, 1], [], []>} : vector<8x128xbf16>, vector<128x128xbf16>, vector<8x128xf32> -> vector<8x128xf32>
    %c2_16 = arith.constant 2 : index
    %c0_17 = arith.constant 0 : index
    %23 = vector.load %arg3[%c2_16, %c0_17] : memref<3x128xf32, #tpu.memory_space<vmem>>, vector<1x128xf32>
    %24 = vector.broadcast %23 : vector<1x128xf32> to vector<8x128xf32>
    %25 = arith.addf %22, %24 : vector<8x128xf32>
    %c0_18 = arith.constant 0 : index
    %c0_19 = arith.constant 0 : index
    %26 = vector.load %arg4[%c0_18, %c0_19] : memref<8x128xf32, #tpu.memory_space<vmem>>, vector<8x128xf32>
    tpu.vector_store %arg4[%c0_18, %c0_19], %25 {strides = array<i32>} : memref<8x128xf32, #tpu.memory_space<vmem>>, vector<8x128xf32>,
    return
  }
  func.func @transform_0(%arg0: i32) -> (i32, i32) {
    %c0_i32 = arith.constant 0 : i32
    %c0_i32_0 = arith.constant 0 : i32
    return %arg0, %c0_i32 : i32, i32
  }
  func.func @transform_1(%arg0: i32) -> (i32, i32, i32) {
    %c0_i32 = arith.constant 0 : i32
    %c0_i32_0 = arith.constant 0 : i32
    %c0_i32_1 = arith.constant 0 : i32
    %c0_i32_2 = arith.constant 0 : i32
    return %c0_i32, %c0_i32_0, %c0_i32_1 : i32, i32, i32
  }
  func.func @transform_2(%arg0: i32) -> (i32, i32) {
    %c0_i32 = arith.constant 0 : i32
    %c0_i32_0 = arith.constant 0 : i32
    %c0_i32_1 = arith.constant 0 : i32
    return %c0_i32, %c0_i32_0 : i32, i32
  }
  func.func @transform_3(%arg0: i32) -> (i32, i32) {
    %c0_i32 = arith.constant 0 : i32
    %c0_i32_0 = arith.constant 0 : i32
    return %arg0, %c0_i32 : i32, i32
  }
}

</mosaic_0001>

<bundles_post_ra>
// kernel: dqn_forward_padded.1
= control target key start
LH: loop header
LB: loop body
LE: loop exit
PB: predicated region body
PF: predicated region fallthrough
CT: control target
= control target key end

     0   :  { %8 = vsyncpa [#allocation3], 0  ;;  %s545_s0 = inlined_call_operand.vmem [shape: f32[8,4], index: 0, kind: input, shape index: {}]   ;;  %s546_s1 = inlined_call_operand.hbm [shape: bf16[3,128,128], index: 1, kind: input, shape index: {}]   ;;  %s547_s2 = inlined_call_operand.vmem [shape: f32[3,128], index: 2, kind: input, shape index: {}]   ;;  %s548_s3 = inlined_call_operand.hbm [shape: f32[8,128], index: 3, kind: output, shape index: {}]  }
   0x1   :  { %9 = vsyncpa [#allocation4], 0  ;;  %s478_s12 = smov [#allocation2]  }
   0x2   :  { %s17_s13 = sshll.u32 %s478_s12, 4  ;;  %s18_s13 = int_to_ptr.vmem [resolvable:$true] %s17_s13 }
   0x3   :  { %s442_s14 = scalar_lea.vmem %s18_s13, 3072  ;;  %p447_p1 = scmp.lt.s32.totalorder %s18_s13, %s18_s13 }
   0x4   :  { %p443_p0 = scmp.ne.s32.totalorder %s18_s13, %s442_s14  ;;  %p448_p2 = scmp.lt.s32.totalorder %s442_s14, %s442_s14 }
   0x6   :  { %p449_p3 = por %p448_p2, %p447_p1 }
   0x8   :  { %p450_p4 = pnand %p449_p3, %p443_p0 }
   0xa   :  { %453 = shalt.err (!%p450_p4)
}
   0xb   :  { %s479_s15 = smov 64   ;;  %s480_s16 = smov 4  }
   0xc   :  { %23 = dma.hbm_to_vmem [thread:$0]  %s546_s1, 3072, %s18_s13, [#allocation3], %s479_s15, %s479_s15, %s480_s16  }
   0xd   :  { %474 = dma.done.wait [#allocation3], 3072  }
   0xe   :  { %475 = vsyncadd [#allocation3], 4294964224  ;;  %v481_v0 = vmov 0.0   ;;  %vm482_vm0 = vmmov 0   ;;  %vm42_vm1 = vcmask 1041408   ;;  %v30_v2 = vld [vmem:[%s545_s0] sm:$0xff] }
   0xf   :  { %366 = vmatprep.subr.bf16.mxu0 %v481_v0  ;;  %368 = vmatprep.mubr.msk.bf16.mxu0 %vm482_vm0, %v481_v0  ;;  %v32_v1 = vld [vmem:[#allocation2] sm:$0x3]  ;;  %v31_v4 = vpack.c.bf16 %v30_v2, %v30_v2  ;;  %v418_v5 = vld [vmem:[#allocation2 + $0x78] sm:$0xff]   ;;  %vm38_vm2 = vcmask 31744   ;;  %v419_v6 = vld [vmem:[#allocation2 + $0x70] sm:$0xff]   ;;  %s483_s25 = smov [#allocation5]  }
  0x10   :  { %372 = vmatprep.subr.bf16.mxu1 %v481_v0  ;;  %388 = vmatprep.mubr.msk.bf16.mxu1 %vm482_vm0, %v481_v0  ;;  %v44_v3 = vsel %vm42_vm1, %v32_v1, 0  ;;  %v420_v7 = vld [vmem:[#allocation2 + $0x68] sm:$0xff]   ;;  %v421_v8 = vld [vmem:[#allocation2 + $0x60] sm:$0xff]   ;;  %v422_v9 = vld [vmem:[#allocation2 + $0x58] sm:$0xff]   ;;  %s317_s26 = sshll.u32 %s483_s25, 4  ;;  %s318_s26 = int_to_ptr.vmem [resolvable:$true] %s317_s26 }
  0x11   :  { %367 = vmatpush3.bf16.msra.mxu0 %v44_v3  ;;  %373 = vmatpush3.bf16.msra.mxu1 %v418_v5  ;;  %v423_v10 = vld [vmem:[#allocation2 + $0x50] sm:$0xff]   ;;  %v424_v11 = vld [vmem:[#allocation2 + $0x48] sm:$0xff]   ;;  %v425_v12 = vld [vmem:[#allocation2 + $0x40] sm:$0xff]   ;;  %s454_s27 = scalar_lea.vmem %s318_s26, 128  ;;  %p459_p6 = scmp.lt.s32.totalorder %s318_s26, %s318_s26 }
  0x12   :  { %392 = vmatprep.subr.bf16.mxu0 %v481_v0  ;;  %374 = vmatprep.subr.bf16.mxu1 %v481_v0  ;;  %v426_v13 = vld [vmem:[#allocation2 + $0xb8] sm:$0xff]   ;;  %v427_v14 = vld [vmem:[#allocation2 + $0xb0] sm:$0xff]   ;;  %v428_v15 = vld [vmem:[#allocation2 + $0xa8] sm:$0xff]   ;;  %p455_p5 = scmp.ne.s32.totalorder %s318_s26, %s454_s27  ;;  %p460_p7 = scmp.lt.s32.totalorder %s454_s27, %s454_s27 }
  0x13   :  { %v429_v16 = vld [vmem:[#allocation2 + $0xa0] sm:$0xff]   ;;  %v430_v17 = vld [vmem:[#allocation2 + $0x98] sm:$0xff]   ;;  %v431_v18 = vld [vmem:[#allocation2 + $0x90] sm:$0xff]  }
  0x14   :  { %369 = vmatmul.mubr.msk.bf16.vlgmr.msra.gmra.mxu0 %vm38_vm2, %v31_v4  ;;  %v326_v19 = vld [vmem:[%s547_s2] ss:$0 sm:$0xff]  ;;  %v432_v27 = vld [vmem:[#allocation2 + $0x88] sm:$0xff]   ;;  %v328_v29 = vld [vmem:[%s547_s2 + $0x1] ss:$0 sm:$0xff]  ;;  %p461_p8 = por %p460_p7, %p459_p6 }
  0x15   :  { %408 = vmatprep.mubr.msk.bf16.mxu0 %vm482_vm0, %v481_v0  ;;  %375 = vmatpush3.bf16.msra.mxu1 %v419_v6  ;;  %v433_v28 = vld [vmem:[#allocation2 + $0x80] sm:$0xff]  }
  0x16   :  { %376 = vmatprep.subr.bf16.mxu1 %v481_v0  ;;  %393 = vmatpush3.bf16.msra.mxu0 %v426_v13  ;;  %v337_v37 = vld [vmem:[%s547_s2 + $0x2] ss:$0 sm:$0xff]  ;;  %p462_p9 = pnand %p461_p8, %p455_p5 }
  0x17   :  { %394 = vmatprep.subr.bf16.mxu0 %v481_v0 }
  0x19   :  { %377 = vmatpush3.bf16.msra.mxu1 %v420_v7 }
  0x1a   :  { %378 = vmatprep.subr.bf16.mxu1 %v481_v0  ;;  %395 = vmatpush3.bf16.msra.mxu0 %v427_v14 }
  0x1b   :  { %396 = vmatprep.subr.bf16.mxu0 %v481_v0 }
  0x1d   :  { %379 = vmatpush3.bf16.msra.mxu1 %v421_v8 }
  0x1e   :  { %380 = vmatprep.subr.bf16.mxu1 %v481_v0  ;;  %397 = vmatpush3.bf16.msra.mxu0 %v428_v15 }
  0x1f   :  { %398 = vmatprep.subr.bf16.mxu0 %v481_v0 }
  0x21   :  { %381 = vmatpush3.bf16.msra.mxu1 %v422_v9 }
  0x22   :  { %382 = vmatprep.subr.bf16.mxu1 %v481_v0  ;;  %399 = vmatpush3.bf16.msra.mxu0 %v429_v16 }
  0x23   :  { %400 = vmatprep.subr.bf16.mxu0 %v481_v0 }
  0x25   :  { %383 = vmatpush3.bf16.msra.mxu1 %v423_v10 }
  0x26   :  { %384 = vmatprep.subr.bf16.mxu1 %v481_v0  ;;  %401 = vmatpush3.bf16.msra.mxu0 %v430_v17 }
  0x27   :  { %402 = vmatprep.subr.bf16.mxu0 %v481_v0 }
  0x29   :  { %385 = vmatpush3.bf16.msra.mxu1 %v424_v11 }
  0x2a   :  { %386 = vmatprep.subr.bf16.mxu1 %v481_v0  ;;  %403 = vmatpush3.bf16.msra.mxu0 %v431_v18 }
  0x2b   :  { %404 = vmatprep.subr.bf16.mxu0 %v481_v0 }
  0x2d   :  { %387 = vmatpush3.bf16.msra.mxu1 %v425_v12 }
  0x2e   :  { %405 = vmatpush3.bf16.msra.mxu0 %v432_v27 }
  0x2f   :  { %406 = vmatprep.subr.bf16.mxu0 %v481_v0 }
  0x32   :  { %407 = vmatpush3.bf16.msra.mxu0 %v433_v28 }
  0xd4   :  { %v80_v20 = vpop.f32.mrf.mxu0 }
  0xd5   :  { %v81_v21 = vadd.f32 %v326_v19, %v80_v20 }
  0xd6   :  { %v370_v22 = vpop.f32.mrf.mxu0 }
  0xd7   :  { %v86_v23 = vmax.f32 %v81_v21, 0.0 }
  0xd8   :  { %v83_v24 = vpop.f32.mrf.mxu0 }
  0xd9   :  { %v87_v25 = vpack.c.bf16 %v86_v23, %v86_v23 }
  0xda   :  { %v371_v26 = vpop.f32.mrf.mxu0 }
  0xdb   :  { %389 = vmatmul.mubr.bf16.vlgmr.msra.gmra.mxu1 %v87_v25 }
 0x19b   :  { %v192_v30 = vpop.f32.mrf.mxu1 }
 0x19c   :  { %v193_v31 = vadd.f32 %v328_v29, %v192_v30 }
 0x19d   :  { %v390_v32 = vpop.f32.mrf.mxu1 }
 0x19e   :  { %v198_v33 = vmax.f32 %v193_v31, 0.0 }
 0x19f   :  { %v195_v34 = vpop.f32.mrf.mxu1 }
 0x1a0   :  { %v199_v35 = vpack.c.bf16 %v198_v33, %v198_v33 }
 0x1a1   :  { %v391_v36 = vpop.f32.mrf.mxu1 }
 0x1a2   :  { %409 = vmatmul.mubr.bf16.vlgmr.msra.gmra.mxu0 %v199_v35 }
 0x262   :  { %v304_v38 = vpop.f32.mrf.mxu0 }
 0x263   :  { %v305_v39 = vadd.f32 %v337_v37, %v304_v38 }
 0x264   :  { %v410_v40 = vpop.f32.mrf.mxu0 }
 0x265   :  { %310 = vst [vmem:[#allocation5] sm:$0xff] %v305_v39 }
 0x266   :  { %v307_v41 = vpop.f32.mrf.mxu0 }
 0x267   :  { %465 = shalt.err (!%p462_p9)
}
 0x268   :  { %320 = dma.vmem_to_hbm [thread:$0]  %s318_s26, 128, %s548_s3, [#allocation4]   ;;  %v411_v42 = vpop.f32.mrf.mxu0 }
 0x269   :  { %476 = dma.done.wait [#allocation4], 128  }
 0x26a   :  { %477 = vsyncadd [#allocation4], 4294967168 }
 0x26b   :  { %324 = vsyncpa [#allocation3], 1 }
 0x26c   :  { %325 = vsyncpa [#allocation4], 1 }

</bundles_post_ra>
